<compile_context>
chip_gen: v7x
topology: tpu7x:2x2x1
jax: 0.10.0
libtpu: 0.0.40
codegen_flags: <defaults>
</compile_context>

<pallas_src>
import jax
import jax.numpy as jnp
from jax.experimental import pallas as pl
from jax.experimental.pallas import tpu as pltpu


def forex_kernel(x_ref, w1_ref, b1_ref, w2_ref, b2_ref, w3_ref, b3_ref, o_ref):
    # x tile: (in_size, tb), batch on lanes. Cast to bf16 for the MXU.
    x = x_ref[...].astype(jnp.bfloat16)

    # fc1 + ReLU: (hidden, in) @ (in, tb) -> (hidden, tb), f32 accumulation.
    h1 = jnp.dot(w1_ref[...], x, preferred_element_type=jnp.float32)
    h1 = jnp.maximum(h1 + b1_ref[...], 0.0)

    # fc2 + ReLU: (hidden, hidden) @ (hidden, tb) -> (hidden, tb).
    h2 = jnp.dot(w2_ref[...], h1.astype(jnp.bfloat16),
                 preferred_element_type=jnp.float32)
    h2 = jnp.maximum(h2 + b2_ref[...], 0.0)

    # fc3 + sigmoid: (out, hidden) @ (hidden, tb) -> (out, tb); lane-dense output.
    logits = jnp.dot(w3_ref[...], h2.astype(jnp.bfloat16),
                     preferred_element_type=jnp.float32)
    logits = logits + b3_ref[...]
    # exp -> EUP, approx reciprocal -> EUP: both off the VALU.
    o_ref[...] = pl.reciprocal(1.0 + jnp.exp(-logits), approx=True).astype(o_ref.dtype)


def forex_net(x, params, *, batch_tile=4096):
    """Fused forward pass.

    x: (batch, input_size) f32 (standard module layout).
    params: PyTorch-native layout — w: (out_features, in_features), b: (out_features, 1).
    Returns (batch, output_size) f32.
    """
    w1, b1, w2, b2, w3, b3 = params
    batch, in_size = x.shape
    out_size = w3.shape[0]

    # Pre-cast MXU operands to bf16 once, outside the kernel (biases stay f32).
    w1b = w1.astype(jnp.bfloat16)
    w2b = w2.astype(jnp.bfloat16)
    w3b = w3.astype(jnp.bfloat16)

    # Batch-on-lanes layout: feed x as (in_size, batch). Layout plumbing only.
    x_t = x.T

    # Tile selection:
    #  * batch <= batch_tile: single grid step, block == full dims (always legal).
    #  * otherwise: tile is a multiple of 128 (lane divisibility); a partial last
    #    tile is handled by Pallas block padding/discard semantics.
    if batch <= batch_tile:
        tb = batch
    else:
        tb = max(128, (batch_tile // 128) * 128)
    grid = (pl.cdiv(batch, tb),)

    # Weights/biases: constant block index -> VMEM-resident across the whole grid.
    def resident(shape):
        return pl.BlockSpec(shape, lambda i: (0, 0))

    out_t = pl.pallas_call(
        forex_kernel,
        out_shape=jax.ShapeDtypeStruct((out_size, batch), jnp.float32),
        grid=grid,
        in_specs=[
            pl.BlockSpec((in_size, tb), lambda i: (0, i)),   # x^T: tiled over batch (lanes)
            resident(w1b.shape), resident(b1.shape),
            resident(w2b.shape), resident(b2.shape),
            resident(w3b.shape), resident(b3.shape),
        ],
        out_specs=pl.BlockSpec((out_size, tb), lambda i: (0, i)),
        compiler_params=pltpu.CompilerParams(
            # Batch grid shards across v7x's 2 TensorCores; no-op on v5e/v6e.
            dimension_semantics=("parallel",),
        ),
    )(x_t, w1b, b1, w2b, b2, w3b, b3)

    # Back to the module's (batch, output_size) layout.
    return out_t.T


def init_params(key, input_size, hidden_size, output_size):
    """PyTorch-native layout: W (out_features, in_features), b (out_features, 1);
    default Linear init U(-1/sqrt(fan_in), 1/sqrt(fan_in))."""
    ks = jax.random.split(key, 6)

    def linear(kw, kb, fan_in, fan_out):
        bound = 1.0 / jnp.sqrt(fan_in)
        w = jax.random.uniform(kw, (fan_out, fan_in), jnp.float32, -bound, bound)
        b = jax.random.uniform(kb, (fan_out, 1), jnp.float32, -bound, bound)
        return w, b

    w1, b1 = linear(ks[0], ks[1], input_size, hidden_size)
    w2, b2 = linear(ks[2], ks[3], hidden_size, hidden_size)
    w3, b3 = linear(ks[4], ks[5], hidden_size, output_size)
    return (w1, b1, w2, b2, w3, b3)


def reference(x, params):
    """Pure-JAX reference matching the PyTorch module (x @ W^T + b)."""
    w1, b1, w2, b2, w3, b3 = params
    h1 = jnp.maximum(x @ w1.T + b1.T, 0.0)
    h2 = jnp.maximum(h1 @ w2.T + b2.T, 0.0)
    return jax.nn.sigmoid(h2 @ w3.T + b3.T)


if __name__ == "__main__":
    input_size, hidden_size, output_size = 16, 32, 1

    key = jax.random.PRNGKey(0)
    kx, kp, kx2 = jax.random.split(key, 3)
    params = init_params(kp, input_size, hidden_size, output_size)

    # Tolerance loosened vs pure-f32: bf16 MXU operands + approx EUP reciprocal.
    ATOL = 2e-2

    # Small batch: single grid step (block == full dims).
    batch = 8
    x = jax.random.normal(kx, (batch, input_size), dtype=jnp.float32)
    out = jax.block_until_ready(forex_net(x, params))
    ref = reference(x, params)
    assert out.shape == (batch, output_size)
    assert jnp.allclose(out, ref, atol=ATOL, rtol=ATOL), "mismatch vs reference (batch=8)"

    # Larger batch with a 128-wide tile: 2 grid steps (even -> balanced across
    # v7x's two TensorCores), exercises resident weights + lane-tiled x/out DMA.
    batch2, tile2 = 256, 128
    x2 = jax.random.normal(kx2, (batch2, input_size), dtype=jnp.float32)
    out2 = jax.block_until_ready(forex_net(x2, params, batch_tile=tile2))
    ref2 = reference(x2, params)
    assert out2.shape == (batch2, output_size)
    assert jnp.allclose(out2, ref2, atol=ATOL, rtol=ATOL), "mismatch vs reference (batch=256)"

    print("KERNEL_OK")
</pallas_src>

<mosaic_0001>
module attributes {stable_mosaic.version = 11 : i64} {
  func.func @forex_kernel(%arg0: i32, %arg1: memref<16x8xf32, #tpu.memory_space<vmem>>, %arg2: memref<32x16xbf16, #tpu.memory_space<vmem>>, %arg3: memref<32x1xf32, #tpu.memory_space<vmem>>, %arg4: memref<32x32xbf16, #tpu.memory_space<vmem>>, %arg5: memref<32x1xf32, #tpu.memory_space<vmem>>, %arg6: memref<1x32xbf16, #tpu.memory_space<vmem>>, %arg7: memref<1x1xf32, #tpu.memory_space<vmem>>, %arg8: memref<1x8xf32, #tpu.memory_space<vmem>>) attributes {dimension_semantics = [#tpu.dimension_semantics<parallel>], iteration_bounds = array<i64: 1>, scalar_prefetch = 0 : i64, scratch_operands = 0 : i64, tpu.core_type = #tpu.core_type<tc>, window_params = [{transform_indices = @transform_0, window_bounds = array<i64: 16, 8>}, {pipeline_mode = #tpu.pipeline_mode<synchronous>, transform_indices = @transform_1, window_bounds = array<i64: 32, 16>}, {pipeline_mode = #tpu.pipeline_mode<synchronous>, transform_indices = @transform_2, window_bounds = array<i64: 32, 1>}, {pipeline_mode = #tpu.pipeline_mode<synchronous>, transform_indices = @transform_3, window_bounds = array<i64: 32, 32>}, {pipeline_mode = #tpu.pipeline_mode<synchronous>, transform_indices = @transform_4, window_bounds = array<i64: 32, 1>}, {pipeline_mode = #tpu.pipeline_mode<synchronous>, transform_indices = @transform_5, window_bounds = array<i64: 1, 32>}, {pipeline_mode = #tpu.pipeline_mode<synchronous>, transform_indices = @transform_6, window_bounds = array<i64: 1, 1>}, {transform_indices = @transform_7, window_bounds = array<i64: 1, 8>}]} {
    %c0 = arith.constant 0 : index
    %c0_0 = arith.constant 0 : index
    %0 = vector.load %arg1[%c0, %c0_0] : memref<16x8xf32, #tpu.memory_space<vmem>>, vector<16x8xf32>
    %1 = arith.truncf %0 : vector<16x8xf32> to vector<16x8xbf16>
    %c0_1 = arith.constant 0 : index
    %c0_2 = arith.constant 0 : index
    %2 = vector.load %arg2[%c0_1, %c0_2] : memref<32x16xbf16, #tpu.memory_space<vmem>>, vector<32x16xbf16>
    %cst = arith.constant dense<0.000000e+00> : vector<32x8xf32>
    %3 = tpu.matmul %2, %1, %cst {dimension_numbers = #tpu.dot_dimension_numbers<[1], [0], [0], [1], [0, 0, 1, 1], [], []>} : vector<32x16xbf16>, vector<16x8xbf16>, vector<32x8xf32> -> vector<32x8xf32>
    %c0_3 = arith.constant 0 : index
    %c0_4 = arith.constant 0 : index
    %4 = vector.load %arg3[%c0_3, %c0_4] : memref<32x1xf32, #tpu.memory_space<vmem>>, vector<32x1xf32>
    %5 = vector.broadcast %4 : vector<32x1xf32> to vector<32x8xf32>
    %6 = arith.addf %3, %5 : vector<32x8xf32>
    %cst_5 = arith.constant 0.000000e+00 : f32
    %7 = vector.broadcast %cst_5 : f32 to vector<32x8xf32>
    %8 = arith.maximumf %6, %7 : vector<32x8xf32>
    %c0_6 = arith.constant 0 : index
    %c0_7 = arith.constant 0 : index
    %9 = vector.load %arg4[%c0_6, %c0_7] : memref<32x32xbf16, #tpu.memory_space<vmem>>, vector<32x32xbf16>
    %10 = arith.truncf %8 : vector<32x8xf32> to vector<32x8xbf16>
    %cst_8 = arith.constant dense<0.000000e+00> : vector<32x8xf32>
    %11 = tpu.matmul %9, %10, %cst_8 {dimension_numbers = #tpu.dot_dimension_numbers<[1], [0], [0], [1], [0, 0, 1, 1], [], []>} : vector<32x32xbf16>, vector<32x8xbf16>, vector<32x8xf32> -> vector<32x8xf32>
    %c0_9 = arith.constant 0 : index
    %c0_10 = arith.constant 0 : index
    %12 = vector.load %arg5[%c0_9, %c0_10] : memref<32x1xf32, #tpu.memory_space<vmem>>, vector<32x1xf32>
    %13 = vector.broadcast %12 : vector<32x1xf32> to vector<32x8xf32>
    %14 = arith.addf %11, %13 : vector<32x8xf32>
    %cst_11 = arith.constant 0.000000e+00 : f32
    %15 = vector.broadcast %cst_11 : f32 to vector<32x8xf32>
    %16 = arith.maximumf %14, %15 : vector<32x8xf32>
    %c0_12 = arith.constant 0 : index
    %c0_13 = arith.constant 0 : index
    %17 = vector.load %arg6[%c0_12, %c0_13] : memref<1x32xbf16, #tpu.memory_space<vmem>>, vector<1x32xbf16>
    %18 = arith.truncf %16 : vector<32x8xf32> to vector<32x8xbf16>
    %cst_14 = arith.constant dense<0.000000e+00> : vector<1x8xf32>
    %19 = tpu.matmul %17, %18, %cst_14 {dimension_numbers = #tpu.dot_dimension_numbers<[1], [0], [0], [1], [0, 0, 1, 1], [], []>} : vector<1x32xbf16>, vector<32x8xbf16>, vector<1x8xf32> -> vector<1x8xf32>
    %c0_15 = arith.constant 0 : index
    %c0_16 = arith.constant 0 : index
    %20 = vector.load %arg7[%c0_15, %c0_16] : memref<1x1xf32, #tpu.memory_space<vmem>>, vector<1x1xf32>
    %21 = vector.broadcast %20 : vector<1x1xf32> to vector<1x8xf32>
    %22 = arith.addf %19, %21 : vector<1x8xf32>
    %cst_17 = arith.constant 0.000000e+00 : f32
    %23 = vector.broadcast %cst_17 : f32 to vector<1x8xf32>
    %24 = arith.subf %23, %22 : vector<1x8xf32>
    %25 = math.exp %24 : vector<1x8xf32>
    %cst_18 = arith.constant 1.000000e+00 : f32
    %26 = vector.broadcast %cst_18 : f32 to vector<1x8xf32>
    %27 = arith.addf %26, %25 : vector<1x8xf32>
    %28 = tpu.reciprocal %27 {approx = true} : vector<1x8xf32> -> vector<1x8xf32>
    %c0_19 = arith.constant 0 : index
    %c0_20 = arith.constant 0 : index
    %29 = vector.load %arg8[%c0_19, %c0_20] : memref<1x8xf32, #tpu.memory_space<vmem>>, vector<1x8xf32>
    tpu.vector_store %arg8[%c0_19, %c0_20], %28 {strides = array<i32>} : memref<1x8xf32, #tpu.memory_space<vmem>>, vector<1x8xf32>,
    return
  }
  func.func @transform_0(%arg0: i32) -> (i32, i32) {
    %c0_i32 = arith.constant 0 : i32
    %c0_i32_0 = arith.constant 0 : i32
    return %c0_i32, %arg0 : i32, i32
  }
  func.func @transform_1(%arg0: i32) -> (i32, i32) {
    %c0_i32 = arith.constant 0 : i32
    %c0_i32_0 = arith.constant 0 : i32
    %c0_i32_1 = arith.constant 0 : i32
    return %c0_i32, %c0_i32_0 : i32, i32
  }
  func.func @transform_2(%arg0: i32) -> (i32, i32) {
    %c0_i32 = arith.constant 0 : i32
    %c0_i32_0 = arith.constant 0 : i32
    %c0_i32_1 = arith.constant 0 : i32
    return %c0_i32, %c0_i32_0 : i32, i32
  }
  func.func @transform_3(%arg0: i32) -> (i32, i32) {
    %c0_i32 = arith.constant 0 : i32
    %c0_i32_0 = arith.constant 0 : i32
    %c0_i32_1 = arith.constant 0 : i32
    return %c0_i32, %c0_i32_0 : i32, i32
  }
  func.func @transform_4(%arg0: i32) -> (i32, i32) {
    %c0_i32 = arith.constant 0 : i32
    %c0_i32_0 = arith.constant 0 : i32
    %c0_i32_1 = arith.constant 0 : i32
    return %c0_i32, %c0_i32_0 : i32, i32
  }
  func.func @transform_5(%arg0: i32) -> (i32, i32) {
    %c0_i32 = arith.constant 0 : i32
    %c0_i32_0 = arith.constant 0 : i32
    %c0_i32_1 = arith.constant 0 : i32
    return %c0_i32, %c0_i32_0 : i32, i32
  }
  func.func @transform_6(%arg0: i32) -> (i32, i32) {
    %c0_i32 = arith.constant 0 : i32
    %c0_i32_0 = arith.constant 0 : i32
    %c0_i32_1 = arith.constant 0 : i32
    return %c0_i32, %c0_i32_0 : i32, i32
  }
  func.func @transform_7(%arg0: i32) -> (i32, i32) {
    %c0_i32 = arith.constant 0 : i32
    %c0_i32_0 = arith.constant 0 : i32
    return %c0_i32, %arg0 : i32, i32
  }
}

</mosaic_0001>

<bundles_post_ra>
// kernel: tpu_custom_call.1
= control target key start
LH: loop header
LB: loop body
LE: loop exit
PB: predicated region body
PF: predicated region fallthrough
CT: control target
= control target key end

     0   :  { %s496_s0 = inlined_call_operand.vmem [shape: f32[16,8], index: 0, kind: input, shape index: {}]   ;;  %s497_s1 = inlined_call_operand.vmem [shape: bf16[32,16], index: 1, kind: input, shape index: {}]   ;;  %s498_s2 = inlined_call_operand.vmem [shape: f32[32,1], index: 2, kind: input, shape index: {}]   ;;  %s499_s3 = inlined_call_operand.vmem [shape: bf16[32,32], index: 3, kind: input, shape index: {}]   ;;  %s500_s4 = inlined_call_operand.vmem [shape: f32[32,1], index: 4, kind: input, shape index: {}]   ;;  %s501_s5 = inlined_call_operand.vmem [shape: bf16[1,32], index: 5, kind: input, shape index: {}]   ;;  %s502_s6 = inlined_call_operand.<no memory space> [shape: f32[1,1], index: 6, kind: input, shape index: {}]   ;;  %s503_s7 = inlined_call_operand.hbm [shape: f32[1,8], index: 7, kind: output, shape index: {}]  }
   0x1   :  { %v12_v0 = vstv %s502_s6 }
   0x2   :  { %13 = vst [vmem:[#allocation2] sm:$0x1] %v12_v0 }
   0x3   :  { %v30_v1 = vld [vmem:[%s496_s0] sm:$0xff]  ;;  %v31_v2 = vld [vmem:[%s496_s0 + $0x8] sm:$0xff]  ;;  %vm71_vm0 = vcmask 130048   ;;  %v387_v5 = vmov 0   ;;  %v39_v8 = vld [vmem:[%s498_s2 + $0x10] sm:$0xff] }
   0x4   :  { %v32_v3 = vpack.c.bf16 %v31_v2, %v30_v1  ;;  %v355_v4 = vld [vmem:[%s497_s1] sm:$0xff]   ;;  %353 = vset.pattern.permute.xlu0 %v387_v5  ;;  %354 = vset.pattern.permute.xlu1 %v387_v5  ;;  %v356_v7 = vld [vmem:[%s497_s1 + $0x8] sm:$0xff]   ;;  %v40_v10 = vld [vmem:[%s498_s2 + $0x18] sm:$0xff] }
   0x5   :  { %v37_v6 = vld [vmem:[%s498_s2] sm:$0xff]  ;;  %329 = vmatprep.mubr.msk.bf16.mxu0 %vm71_vm0, %v355_v4  ;;  %v38_v9 = vld [vmem:[%s498_s2 + $0x8] sm:$0xff]  ;;  %53 = vperm.xlu1 %354, %v39_v8  }
   0x6   :  { %327 = vmatprep.subr.bf16.mxu0 %v32_v3  ;;  %43 = vperm.xlu0 %353, %v37_v6  }
   0x7   :  { %328 = vmatpush3.bf16.msra.mxu0 %v32_v3 }
   0xa   :  { %330 = vmatmul.mubr.msk.bf16.vlgmr.msra.gmra.mrb[0].mxu0 %vm71_vm0, %v356_v7 }
   0xb   :  { %14 = vsyncpa [#allocation4], 0  ;;  %48 = vperm.xlu0 %353, %v38_v9   ;;  %v137_v11 = vld [vmem:[%s500_s4] sm:$0xff]  ;;  %58 = vperm.xlu1 %354, %v40_v10   ;;  %v138_v12 = vld [vmem:[%s500_s4 + $0x8] sm:$0xff]  ;;  %vm171_vm1 = vcmask 261120   ;;  %v388_v36 = vmov 0.0   ;;  %v240_v56 = vlaneseq }
   0xc   :  { %v139_v13 = vld [vmem:[%s500_s4 + $0x10] sm:$0xff]  ;;  %v140_v14 = vld [vmem:[%s500_s4 + $0x18] sm:$0xff]  ;;  %v234_v15 = vld [vmem:[#allocation2] sm:$0x1]  ;;  %341 = vmatprep.subr.bf16.mxu0 %v388_v36  ;;  %vm389_vm2 = vmmov 0   ;;  %s390_s27 = smov [#allocation3]  }
   0xd   :  { %v357_v16 = vld [vmem:[%s499_s3] sm:$0xff]   ;;  %v358_v35 = vld [vmem:[%s499_s3 + $0x8] sm:$0xff]   ;;  %345 = vmatprep.mubr.msk.bf16.mxu0 %vm389_vm2, %v388_v36  ;;  %v241_v57 = vshrl.u32 %v240_v56, 7  ;;  %vm292_vm3 = vcmask 57344  }
   0xe   :  { %337 = vmatprep.mubr.msk.bf16.mxu1 %vm171_vm1, %v357_v16  ;;  %v231_v55 = vld [vmem:[%s501_s5] sm:$0x1]  ;;  %s300_s5 = sshll.u32 %s390_s27, 4  ;;  %s301_s5 = int_to_ptr.vmem [resolvable:$true] %s300_s5 }
   0xf   :  { %143 = vperm.xlu0 %353, %v137_v11   ;;  %148 = vperm.xlu1 %354, %v138_v12   ;;  %v242_v58 = vsub.s32 0, %v241_v57  ;;  %s363_s28 = scalar_lea.vmem %s301_s5, 16  ;;  %s367_s29 = scalar_lea.vmem %s301_s5, 32 }
  0x10   :  { %p364_p0 = scmp.ne.s32.totalorder %s301_s5, %s363_s28  ;;  %p368_p1 = scmp.lt.s32.totalorder %s301_s5, %s301_s5 }
  0x11   :  { %p369_p2 = scmp.lt.s32.totalorder %s367_s29, %s363_s28 }
  0x13   :  { %153 = vperm.xlu0 %353, %v139_v13   ;;  %158 = vperm.xlu1 %354, %v140_v14   ;;  %p370_p3 = por %p369_p2, %p368_p1 }
  0x15   :  { %p371_p4 = pnand %p370_p3, %p364_p0 }
  0x17   :  { %237 = vperm.xlu0 %353, %v234_v15  }
  0x84   :  { %v54_v17 = vpop.permute.xlu1 %53 }
  0x85   :  { %v44_v18 = vpop.permute.xlu0 %43 }
  0x8a   :  { %v59_v22 = vpop.permute.xlu1 %58  ;;  %v49_v25 = vpop.permute.xlu0 %48 }
  0x8e   :  { %v144_v37 = vpop.permute.xlu0 %143  ;;  %v149_v38 = vpop.permute.xlu1 %148 }
  0x92   :  { %v154_v39 = vpop.permute.xlu0 %153  ;;  %v159_v43 = vpop.permute.xlu1 %158 }
  0x96   :  { %v238_v59 = vpop.permute.xlu0 %237 }
  0x97   :  { %v243_v60 = vrot.slane %v238_v59, %v242_v58 }
  0xdd   :  { %v331_v19 = vpop.f32.mrb[0].mxu0 }
  0xde   :  { %v121_v20 = vadd.f32 %v331_v19, %v54_v17  ;;  %v112_v21 = vpop.f32.mrb[1].mxu0 }
  0xdf   :  { %v113_v23 = vadd.f32 %v112_v21, %v44_v18  ;;  %v332_v24 = vpop.f32.mrb[2].mxu0 }
  0xe0   :  { %v124_v26 = vadd.f32 %v332_v24, %v59_v22  ;;  %v115_v27 = vpop.f32.mrb[3].mxu0  ;;  %v129_v29 = vmax.f32 %v121_v20, 0.0 }
  0xe1   :  { %v116_v28 = vadd.f32 %v115_v27, %v49_v25  ;;  %v127_v31 = vmax.f32 %v113_v23, 0.0 }
  0xe2   :  { %v130_v30 = vmax.f32 %v124_v26, 0.0 }
  0xe3   :  { %v128_v32 = vmax.f32 %v116_v28, 0.0 }
  0xe4   :  { %v136_v33 = vpack.c.bf16 %v130_v30, %v129_v29 }
  0xe5   :  { %v135_v34 = vpack.c.bf16 %v128_v32, %v127_v31 }
  0xe7   :  { %333 = vmatprep.subr.bf16.mxu1 %v135_v34 }
  0xe8   :  { %334 = vmatpush3.bf16.msra.mxu1 %v135_v34 }
  0xe9   :  { %335 = vmatprep.subr.bf16.mxu1 %v136_v33 }
  0xec   :  { %336 = vmatpush3.bf16.msra.mxu1 %v136_v33 }
  0xef   :  { %338 = vmatmul.mubr.msk.bf16.vlgmr.msra.gmra.mrb[0].mxu1 %vm171_vm1, %v358_v35 }
 0x1c2   :  { %v339_v40 = vpop.f32.mrb[0].mxu1 }
 0x1c3   :  { %v221_v41 = vadd.f32 %v339_v40, %v154_v39  ;;  %v212_v42 = vpop.f32.mrb[1].mxu1 }
 0x1c4   :  { %v213_v44 = vadd.f32 %v212_v42, %v144_v37  ;;  %v340_v45 = vpop.f32.mrb[2].mxu1 }
 0x1c5   :  { %v224_v46 = vadd.f32 %v340_v45, %v159_v43  ;;  %v215_v47 = vpop.f32.mrb[3].mxu1  ;;  %v229_v49 = vmax.f32 %v221_v41, 0.0 }
 0x1c6   :  { %v216_v48 = vadd.f32 %v215_v47, %v149_v38  ;;  %v227_v51 = vmax.f32 %v213_v44, 0.0 }
 0x1c7   :  { %v230_v50 = vmax.f32 %v224_v46, 0.0 }
 0x1c8   :  { %v228_v52 = vmax.f32 %v216_v48, 0.0 }
 0x1c9   :  { %v233_v53 = vpack.c.bf16 %v230_v50, %v229_v49 }
 0x1ca   :  { %v232_v54 = vpack.c.bf16 %v228_v52, %v227_v51 }
 0x1cc   :  { %342 = vmatpush3.bf16.msra.mxu0 %v232_v54 }
 0x1cd   :  { %343 = vmatprep.subr.bf16.mxu0 %v388_v36 }
 0x1d0   :  { %344 = vmatpush3.bf16.msra.mxu0 %v233_v53 }
 0x1d3   :  { %346 = vmatmul.mubr.msk.bf16.vlgmr.msra.gmra.mrb[4].mxu0 %vm171_vm1, %v231_v55 }
 0x2a6   :  { %v281_v61 = vpop.f32.mrb[4].mxu0 }
 0x2a7   :  { %v282_v62 = vadd.f32 %v281_v61, %v243_v60  ;;  %v347_v63 = vpop.f32.mrb[5].mxu0 }
 0x2a8   :  { %v284_v0 = vpop.f32.mrb[6].mxu0 }
 0x2a9   :  { %v287_v1 = vsub.f32 0.0, %v282_v62  ;;  %v348_v2 = vpop.f32.mrb[7].mxu0 }
 0x2ab   :  { %v288_v3 = vmul.f32 1.442695, %v287_v1 }
 0x2ad   :  { %359 = vpow2.f32 %v288_v3 }
 0x2b7   :  { %v360_v4 = vpop.eup %359 }
 0x2b8   :  { %v290_v5 = vadd.f32 1.0, %v360_v4 }
 0x2ba   :  { %361 = vrcp.f32 %v290_v5 }
 0x2c4   :  { %v362_v6 = vpop.eup %361 }
 0x2c5   :  { %293 = vst.msk [vmem:[#allocation3] sm:$0x1] %vm292_vm3, %v362_v6 }
 0x2c6   :  { %374 = shalt.err (!%p371_p4)
}
 0x2c7   :  { %s375_s9 = scalar_lea.hbm %s503_s7, 16 }
 0x2c8   :  { %p376_p5 = scmp.ne.s32.totalorder %s503_s7, %s375_s9  ;;  %p379_p6 = scmp.lt.u32.totalorder %s375_s9, %s503_s7 }
 0x2ca   :  { %p381_p7 = pnand %p379_p6, %p376_p5 }
 0x2cc   :  { %384 = shalt.err (!%p381_p7)
}
 0x2cd   :  { %303 = dma.vmem_to_hbm [thread:$0]  %s301_s5, 16, %s503_s7, [#allocation4]  }
 0x2ce   :  { %385 = dma.done.wait [#allocation4], 16  }
 0x2cf   :  { %386 = vsyncadd [#allocation4], 4294967280 }
 0x2d0   :  { %307 = vsyncpa [#allocation4], 1 }

</bundles_post_ra>
